<compile_context>
chip_gen: v6e
topology: v6e:2x2x1
jax: 0.10.0
libtpu: 0.0.40
codegen_flags: <defaults>
</compile_context>

<pallas_src>
import functools
import math

import jax
import jax.numpy as jnp
from jax.experimental import pallas as pl
from jax.experimental.pallas import tpu as pltpu


_VMEM_LIMIT = 64 * 1024 * 1024   # safe ceiling on v7x (64 MiB/TC); headroom on v5e/v6e (128 MiB)
_MAX_ROW_TILE = 256              # large tiles amortize ~0.35us per-grid-step overhead


def _round_up(n, m):
    return ((n + m - 1) // m) * m


def _pick_row_tile(n_rows, max_tile=_MAX_ROW_TILE):
    """Row tile: multiple of 8, <= max_tile, and (when possible) >= 2 grid steps so
    dimension_semantics=('parallel',) can shard the grid across both v7x TensorCores."""
    half = (n_rows + 1) // 2
    t = _round_up(max(half, 1), 8)
    return int(max(8, min(max_tile, t)))


# ----------------------------------------------------------------------------
# Kernel 1: row-tiled Linear  (x @ W + b)  -- used for the edge mapping only
# ----------------------------------------------------------------------------
def _linear_kernel(x_ref, w_ref, b_ref, o_ref):
    o_ref[...] = (
        jnp.dot(x_ref[...], w_ref[...], preferred_element_type=jnp.float32)
        + b_ref[...]
    ).astype(o_ref.dtype)


def linear(x, w, b):
    M, K = x.shape
    K2, N = w.shape
    assert K == K2
    t = _pick_row_tile(M)
    Mp = _round_up(M, t)
    xp = jnp.pad(x, ((0, Mp - M), (0, 0))) if Mp != M else x
    out = pl.pallas_call(
        _linear_kernel,
        out_shape=jax.ShapeDtypeStruct((Mp, N), x.dtype),
        grid=(Mp // t,),
        in_specs=[
            pl.BlockSpec((t, K), lambda i: (i, 0)),
            pl.BlockSpec((K, N), lambda i: (0, 0)),
            pl.BlockSpec((1, N), lambda i: (0, 0)),
        ],
        out_specs=pl.BlockSpec((t, N), lambda i: (i, 0)),
        compiler_params=pltpu.CompilerParams(
            dimension_semantics=("parallel",), vmem_limit_bytes=_VMEM_LIMIT),
    )(xp, w, b.reshape(1, N))
    return out[:M] if Mp != M else out


# ----------------------------------------------------------------------------
# Kernel 2: fused q/skip/k/v projection — one lane-dense (T, F) @ (F, 4F) matmul
#           (computed once per layer for all nodes; K/V are hoisted out of the
#            per-query-tile attention grid)
# ----------------------------------------------------------------------------
def _qkvr_proj_kernel(x_ref, w_ref, b_ref, qr_ref, kv_ref):
    y = (jnp.dot(x_ref[...], w_ref[...], preferred_element_type=jnp.float32)
         + b_ref[...])
    half = y.shape[1] // 2
    qr_ref[...] = y[:, :half].astype(qr_ref.dtype)      # [q | x_r]
    kv_ref[...] = y[:, half:].astype(kv_ref.dtype)      # [k | v]


def qkvr_project(x, w_proj, b_proj, *, row_tile):
    Np, F = x.shape
    four_f = w_proj.shape[1]
    assert Np % row_tile == 0
    return pl.pallas_call(
        _qkvr_proj_kernel,
        out_shape=(jax.ShapeDtypeStruct((Np, four_f // 2), jnp.float32),
                   jax.ShapeDtypeStruct((Np, four_f // 2), jnp.float32)),
        grid=(Np // row_tile,),
        in_specs=[
            pl.BlockSpec((row_tile, F), lambda i: (i, 0)),
            pl.BlockSpec((F, four_f), lambda i: (0, 0)),
            pl.BlockSpec((1, four_f), lambda i: (0, 0)),
        ],
        out_specs=(pl.BlockSpec((row_tile, four_f // 2), lambda i: (i, 0)),
                   pl.BlockSpec((row_tile, four_f // 2), lambda i: (i, 0))),
        compiler_params=pltpu.CompilerParams(
            dimension_semantics=("parallel",), vmem_limit_bytes=_VMEM_LIMIT),
    )(x, w_proj, b_proj)


# ----------------------------------------------------------------------------
# Kernel 3: fused TransformerConv attention (lin_edge folded in-kernel, head-batched,
#           beta gate) + FeedForward2Layer — one pallas_call per layer, grid over
#           destination-node tiles.
# ----------------------------------------------------------------------------
def _conv_ffn_kernel(qr_ref, kv_ref, adj_ref, eraw_ref, we_ref, wbeta_ref,
                     g1_ref, be1_ref, w1_ref, b1_ref, w2_ref, b2_ref,
                     g2_ref, be2_ref, o_ref, *, heads, out_channels, edge_dim):
    f32 = jnp.float32
    H, C = heads, out_channels
    F = H * C
    T = qr_ref.shape[0]
    N = kv_ref.shape[0]
    scale = 1.0 / math.sqrt(C)

    qr = qr_ref[...]
    q = qr[:, :F]                      # (T, F)  queries for this destination tile
    x_r = qr[:, F:]                    # (T, F)  root/skip projection
    kv = kv_ref[...]
    k = kv[:, :F]                      # (N, F)  keys   (precomputed once per layer)
    v = kv[:, F:]                      # (N, F)  values (precomputed once per layer)
    adj = adj_ref[...]                 # (T, N)  1.0 where an edge src->dst exists

    # lin_edge folded in-kernel: one (T*N, edge_dim) @ (edge_dim, F) MXU matmul.
    e = jnp.dot(eraw_ref[...].reshape(T * N, edge_dim), we_ref[...],
                preferred_element_type=f32).reshape(T, N, F)

    # One-hot head selector (compile-time constant): sel[f, h] = 1 iff f // C == h.
    sel = (jax.lax.broadcasted_iota(jnp.int32, (F, H), 0) // C
           == jax.lax.broadcasted_iota(jnp.int32, (F, H), 1)).astype(f32)   # (F, H)
    sel_t = (jax.lax.broadcasted_iota(jnp.int32, (H, F), 1) // C
             == jax.lax.broadcasted_iota(jnp.int32, (H, F), 0)).astype(f32)  # (H, F)

    # Head-batched scores: s[t, n, h] = q[t] . (k[n] + e[t, n]) restricted to head h, / sqrt(C)
    prod = q[:, None, :] * (k[None, :, :] + e)                     # (T, N, F)  VPU
    s = jnp.dot(prod.reshape(T * N, F), sel,
                preferred_element_type=f32).reshape(T, N, H) * scale

    adj3 = adj[:, :, None]
    s = jnp.where(adj3 > 0, s, -1e30)
    m = jnp.max(s, axis=1, keepdims=True)                          # (T, 1, H)
    p = jnp.exp(s - m) * adj3                                      # *adj handles zero in-degree
    denom = jnp.sum(p, axis=1, keepdims=True)
    alpha = p / jnp.maximum(denom, 1e-30)                          # (T, N, H)

    # out[t, f] = sum_n alpha[t, n, head(f)] * (v[n, f] + e[t, n, f])
    alpha_f = jnp.dot(alpha.reshape(T * N, H), sel_t,
                      preferred_element_type=f32).reshape(T, N, F)
    out = jnp.sum(alpha_f * (v[None, :, :] + e), axis=1)           # (T, F)

    # beta gate; lin_beta weights host-folded: logit = out.(w1+w3) + x_r.(w2-w3)
    wb = wbeta_ref[...]                                            # (1, 2F)
    beta = jax.nn.sigmoid(
        jnp.sum(out * wb[:, :F], axis=-1, keepdims=True)
        + jnp.sum(x_r * wb[:, F:], axis=-1, keepdims=True))
    x = beta * x_r + (1.0 - beta) * out                            # TransformerConv output

    # FeedForward2Layer fused: LN -> Linear -> ReLU -> Linear -> +res -> LN
    eps = 1e-5
    mu = jnp.mean(x, axis=-1, keepdims=True)
    xc = x - mu
    var = jnp.mean(xc * xc, axis=-1, keepdims=True)
    ss = xc * jax.lax.rsqrt(var + eps) * g1_ref[...] + be1_ref[...]
    h1 = jnp.dot(ss, w1_ref[...], preferred_element_type=f32) + b1_ref[...]
    h1 = jnp.maximum(h1, 0.0)
    ss2 = jnp.dot(h1, w2_ref[...], preferred_element_type=f32) + b2_ref[...]
    y = x + ss2
    mu2 = jnp.mean(y, axis=-1, keepdims=True)
    yc = y - mu2
    var2 = jnp.mean(yc * yc, axis=-1, keepdims=True)
    o_ref[...] = (yc * jax.lax.rsqrt(var2 + eps) * g2_ref[...] + be2_ref[...]
                  ).astype(o_ref.dtype)


def conv_ffn(qr, kv, adj, e_raw, p, *, heads, out_channels, edge_dim, row_tile):
    Np, two_f = qr.shape
    F = two_f // 2
    ff = p["w1"].shape[1]
    assert Np % row_tile == 0
    kernel = functools.partial(_conv_ffn_kernel, heads=heads,
                               out_channels=out_channels, edge_dim=edge_dim)
    return pl.pallas_call(
        kernel,
        out_shape=jax.ShapeDtypeStruct((Np, F), jnp.float32),
        grid=(Np // row_tile,),
        in_specs=[
            pl.BlockSpec((row_tile, 2 * F), lambda i: (i, 0)),            # [q | x_r] tile
            pl.BlockSpec((Np, 2 * F), lambda i: (0, 0)),                  # [k | v] all nodes
            pl.BlockSpec((row_tile, Np), lambda i: (i, 0)),               # adjacency mask tile
            pl.BlockSpec((row_tile, Np, edge_dim), lambda i: (i, 0, 0)),  # raw (mapped) edge feats
            pl.BlockSpec((edge_dim, F), lambda i: (0, 0)),                # lin_edge weight
            pl.BlockSpec((1, 2 * F), lambda i: (0, 0)),                   # folded beta weights
            pl.BlockSpec((1, F), lambda i: (0, 0)),                       # g1
            pl.BlockSpec((1, F), lambda i: (0, 0)),                       # be1
            pl.BlockSpec((F, ff), lambda i: (0, 0)),                      # w1
            pl.BlockSpec((1, ff), lambda i: (0, 0)),                      # b1
            pl.BlockSpec((ff, F), lambda i: (0, 0)),                      # w2
            pl.BlockSpec((1, F), lambda i: (0, 0)),                       # b2
            pl.BlockSpec((1, F), lambda i: (0, 0)),                       # g2
            pl.BlockSpec((1, F), lambda i: (0, 0)),                       # be2
        ],
        out_specs=pl.BlockSpec((row_tile, F), lambda i: (i, 0)),
        compiler_params=pltpu.CompilerParams(
            dimension_semantics=("parallel",), vmem_limit_bytes=_VMEM_LIMIT),
    )(qr, kv, adj, e_raw, p["we"], p["wbeta_folded"],
      p["g1"].reshape(1, F), p["be1"].reshape(1, F),
      p["w1"], p["b1"].reshape(1, ff), p["w2"], p["b2"].reshape(1, F),
      p["g2"].reshape(1, F), p["be2"].reshape(1, F))


# ----------------------------------------------------------------------------
# GNNWrapper
# ----------------------------------------------------------------------------
class GNNWrapperPallas:
    def __init__(self, in_channels, ff_dim, out_channels, heads, edge_dim,
                 num_layers, edge_starting_dim=768, dropout=0.1, seed=0):
        assert in_channels == heads * out_channels, \
            'in_channels must equal heads * out_channels'
        self.heads = heads
        self.in_channels = in_channels
        self.out_channels = out_channels
        self.edge_dim = edge_dim
        self.ff_dim = ff_dim
        self.num_layers = num_layers
        F = in_channels

        def lin_init(key, fan_in, fan_out, bias=True):
            kw, kb = jax.random.split(key)
            bound = 1.0 / math.sqrt(fan_in)
            w = jax.random.uniform(kw, (fan_in, fan_out), minval=-bound,
                                   maxval=bound, dtype=jnp.float32)
            b = (jax.random.uniform(kb, (fan_out,), minval=-bound, maxval=bound,
                                    dtype=jnp.float32)
                 if bias else jnp.zeros((fan_out,), jnp.float32))
            return w, b

        keys = jax.random.split(jax.random.PRNGKey(seed), 1 + num_layers)
        # self.mapping = nn.Linear(edge_starting_dim, edge_dim)
        self.map_w, self.map_b = lin_init(keys[0], edge_starting_dim, edge_dim)

        self.layers = []
        for i in range(num_layers):
            ks = jax.random.split(keys[1 + i], 8)
            wq, bq = lin_init(ks[0], F, F)
            wk, bk = lin_init(ks[1], F, F)
            wv, bv = lin_init(ks[2], F, F)
            we, _ = lin_init(ks[3], edge_dim, F, bias=False)   # lin_edge (no bias in PyG)
            wskip, bskip = lin_init(ks[4], F, F)
            wbeta, _ = lin_init(ks[5], 3 * F, 1, bias=False)   # lin_beta (no bias in PyG)
            w1, b1 = lin_init(ks[6], F, ff_dim)
            w2, b2 = lin_init(ks[7], ff_dim, F)
            wb = wbeta.reshape(3 * F)
            self.layers.append(dict(
                # raw params (used by the pure-JAX reference)
                wq=wq, bq=bq, wk=wk, bk=bk, wv=wv, bv=bv, we=we,
                wskip=wskip, bskip=bskip, wbeta=wb,
                w1=w1, b1=b1, w2=w2, b2=b2,
                g1=jnp.ones((F,), jnp.float32), be1=jnp.zeros((F,), jnp.float32),
                g2=jnp.ones((F,), jnp.float32), be2=jnp.zeros((F,), jnp.float32),
                # kernel-side packed / folded params
                w_proj=jnp.concatenate([wq, wskip, wk, wv], axis=1),          # (F, 4F) lane-dense
                b_proj=jnp.concatenate([bq, bskip, bk, bv]).reshape(1, 4 * F),
                wbeta_folded=jnp.concatenate(
                    [wb[:F] + wb[2 * F:], wb[F:2 * F] - wb[2 * F:]]).reshape(1, 2 * F),
            ))

    def __call__(self, x, edge_index, edge_attr):
        N = x.shape[0]
        src, dst = edge_index[0], edge_index[1]

        # edge_attr = self.mapping(edge_attr)  -- row-padded Pallas linear over edges
        edge_attr = linear(edge_attr, self.map_w, self.map_b)

        # Densify graph structure ONCE at padded node count (plain-JAX glue; see TODO above).
        row_tile = _pick_row_tile(N)
        Np = _round_up(N, row_tile)
        xp = jnp.pad(x, ((0, Np - N), (0, 0))) if Np != N else x
        adj = jnp.zeros((Np, Np), jnp.float32).at[dst, src].set(1.0)
        e_raw = jnp.zeros((Np, Np, self.edge_dim), edge_attr.dtype).at[dst, src].set(edge_attr)

        for p in self.layers:
            qr, kv = qkvr_project(xp, p["w_proj"], p["b_proj"], row_tile=row_tile)
            xp = conv_ffn(qr, kv, adj, e_raw, p, heads=self.heads,
                          out_channels=self.out_channels, edge_dim=self.edge_dim,
                          row_tile=row_tile)
        return xp[:N] if Np != N else xp


# ----------------------------------------------------------------------------
# Pure-JAX reference (edge-list / segment formulation, mirrors PyG TransformerConv)
# ----------------------------------------------------------------------------
def _rdot(a, b):
    return jnp.dot(a, b, precision=jax.lax.Precision.HIGHEST)


def _ref_ln(z, g, b, eps=1e-5):
    mu = z.mean(-1, keepdims=True)
    var = ((z - mu) ** 2).mean(-1, keepdims=True)
    return (z - mu) / jnp.sqrt(var + eps) * g + b


def ref_forward(x, edge_index, edge_attr, model):
    H, C, F = model.heads, model.out_channels, model.in_channels
    N = x.shape[0]
    src, dst = edge_index[0], edge_index[1]
    E = src.shape[0]

    edge_attr = _rdot(edge_attr, model.map_w) + model.map_b
    for p in model.layers:
        q = (_rdot(x, p["wq"]) + p["bq"]).reshape(N, H, C)
        k = (_rdot(x, p["wk"]) + p["bk"]).reshape(N, H, C)
        v = (_rdot(x, p["wv"]) + p["bv"]).reshape(N, H, C)
        e = _rdot(edge_attr, p["we"]).reshape(E, H, C)
        logits = (q[dst] * (k[src] + e)).sum(-1) / math.sqrt(C)          # (E, H)
        m = jax.ops.segment_max(logits, dst, num_segments=N)
        m = jnp.where(jnp.isfinite(m), m, 0.0)
        pexp = jnp.exp(logits - m[dst])
        ssum = jax.ops.segment_sum(pexp, dst, num_segments=N)
        alpha = pexp / jnp.maximum(ssum[dst], 1e-30)
        msg = (v[src] + e) * alpha[..., None]
        out = jax.ops.segment_sum(msg, dst, num_segments=N).reshape(N, F)
        x_r = _rdot(x, p["wskip"]) + p["bskip"]
        cat = jnp.concatenate([out, x_r, out - x_r], axis=-1)
        beta = jax.nn.sigmoid(_rdot(cat, p["wbeta"].reshape(3 * F, 1)))
        x = beta * x_r + (1.0 - beta) * out
        ss = _ref_ln(x, p["g1"], p["be1"])
        ss2 = _rdot(jax.nn.relu(_rdot(ss, p["w1"]) + p["b1"]), p["w2"]) + p["b2"]
        x = _ref_ln(x + ss2, p["g2"], p["be2"])
    return x


# ----------------------------------------------------------------------------
if __name__ == "__main__":
    N = 16                      # graph nodes (utterances)
    heads, out_channels = 4, 8
    in_channels = heads * out_channels          # 32
    ff_dim = 64
    edge_dim = 32
    edge_starting_dim = 64
    num_layers = 2

    key = jax.random.PRNGKey(0)
    kx, ke = jax.random.split(key)
    x = jax.random.normal(kx, (N, in_channels), dtype=jnp.float32)

    # deterministic ring graph: edges (i-1)->i and (i+1)->i  (E = 2N, unique (src,dst) pairs)
    idx = jnp.arange(N)
    src = jnp.concatenate([(idx - 1) % N, (idx + 1) % N])
    dst = jnp.concatenate([idx, idx])
    edge_index = jnp.stack([src, dst]).astype(jnp.int32)
    E = edge_index.shape[1]
    edge_attr = jax.random.normal(ke, (E, edge_starting_dim), dtype=jnp.float32)

    model = GNNWrapperPallas(in_channels, ff_dim, out_channels, heads, edge_dim,
                             num_layers, edge_starting_dim=edge_starting_dim, seed=0)

    out = model(x, edge_index, edge_attr)
    out = jax.block_until_ready(out)

    ref = ref_forward(x, edge_index, edge_attr, model)
    assert out.shape == (N, in_channels)
    max_err = float(jnp.max(jnp.abs(out - ref)))
    assert max_err < 2e-3, max_err

    print("KERNEL_OK")
</pallas_src>

<mosaic_0001>
module attributes {stable_mosaic.version = 11 : i64} {
  func.func @_linear_kernel(%arg0: i32, %arg1: memref<16x64xf32, #tpu.memory_space<vmem>>, %arg2: memref<64x32xf32, #tpu.memory_space<vmem>>, %arg3: memref<1x32xf32, #tpu.memory_space<vmem>>, %arg4: memref<16x32xf32, #tpu.memory_space<vmem>>) attributes {dimension_semantics = [#tpu.dimension_semantics<parallel>], iteration_bounds = array<i64: 2>, scalar_prefetch = 0 : i64, scratch_operands = 0 : i64, tpu.core_type = #tpu.core_type<tc>, window_params = [{transform_indices = @transform_0, window_bounds = array<i64: 16, 64>}, {pipeline_mode = #tpu.pipeline_mode<synchronous>, transform_indices = @transform_1, window_bounds = array<i64: 64, 32>}, {pipeline_mode = #tpu.pipeline_mode<synchronous>, transform_indices = @transform_2, window_bounds = array<i64: 1, 32>}, {transform_indices = @transform_3, window_bounds = array<i64: 16, 32>}]} {
    %c0 = arith.constant 0 : index
    %c0_0 = arith.constant 0 : index
    %0 = vector.load %arg1[%c0, %c0_0] : memref<16x64xf32, #tpu.memory_space<vmem>>, vector<16x64xf32>
    %c0_1 = arith.constant 0 : index
    %c0_2 = arith.constant 0 : index
    %1 = vector.load %arg2[%c0_1, %c0_2] : memref<64x32xf32, #tpu.memory_space<vmem>>, vector<64x32xf32>
    %cst = arith.constant dense<0.000000e+00> : vector<16x32xf32>
    %2 = tpu.matmul %0, %1, %cst {dimension_numbers = #tpu.dot_dimension_numbers<[1], [0], [0], [1], [0, 0, 1, 1], [], []>} : vector<16x64xf32>, vector<64x32xf32>, vector<16x32xf32> -> vector<16x32xf32>
    %c0_3 = arith.constant 0 : index
    %c0_4 = arith.constant 0 : index
    %3 = vector.load %arg3[%c0_3, %c0_4] : memref<1x32xf32, #tpu.memory_space<vmem>>, vector<1x32xf32>
    %4 = vector.broadcast %3 : vector<1x32xf32> to vector<16x32xf32>
    %5 = arith.addf %2, %4 : vector<16x32xf32>
    %c0_5 = arith.constant 0 : index
    %c0_6 = arith.constant 0 : index
    %6 = vector.load %arg4[%c0_5, %c0_6] : memref<16x32xf32, #tpu.memory_space<vmem>>, vector<16x32xf32>
    tpu.vector_store %arg4[%c0_5, %c0_6], %5 {strides = array<i32>} : memref<16x32xf32, #tpu.memory_space<vmem>>, vector<16x32xf32>,
    return
  }
  func.func @transform_0(%arg0: i32) -> (i32, i32) {
    %c0_i32 = arith.constant 0 : i32
    %c0_i32_0 = arith.constant 0 : i32
    return %arg0, %c0_i32 : i32, i32
  }
  func.func @transform_1(%arg0: i32) -> (i32, i32) {
    %c0_i32 = arith.constant 0 : i32
    %c0_i32_0 = arith.constant 0 : i32
    %c0_i32_1 = arith.constant 0 : i32
    return %c0_i32, %c0_i32_0 : i32, i32
  }
  func.func @transform_2(%arg0: i32) -> (i32, i32) {
    %c0_i32 = arith.constant 0 : i32
    %c0_i32_0 = arith.constant 0 : i32
    %c0_i32_1 = arith.constant 0 : i32
    return %c0_i32, %c0_i32_0 : i32, i32
  }
  func.func @transform_3(%arg0: i32) -> (i32, i32) {
    %c0_i32 = arith.constant 0 : i32
    %c0_i32_0 = arith.constant 0 : i32
    return %arg0, %c0_i32 : i32, i32
  }
}

</mosaic_0001>

<bundles_post_ra>
// kernel: tpu_custom_call.1
= control target key start
LH: loop header
LB: loop body
LE: loop exit
PB: predicated region body
PF: predicated region fallthrough
CT: control target
= control target key end

     0   :  { %8 = vsyncpa [#allocation3], 0  ;;  %s651_s0 = inlined_call_operand.vmem [shape: f32[32,64], index: 0, kind: input, shape index: {}]   ;;  %s652_s1 = inlined_call_operand.vmem [shape: f32[64,32], index: 1, kind: input, shape index: {}]   ;;  %s653_s2 = inlined_call_operand.vmem [shape: f32[1,32], index: 2, kind: input, shape index: {}]   ;;  %s654_s3 = inlined_call_operand.hbm [shape: f32[32,32], index: 3, kind: output, shape index: {}]  }
   0x1   :  { %10 = vsyncpa [#allocation3 + $0x1], 0  ;;  %s521_s12 = smov 0   ;;  %s523_s13 = smov 0  }
   0x2   :  { %s525_s14 = smov 0   ;;  %s527_s15 = smov 0  }
   0x3 LB: > { %s542_s16 = sadd.s32 4294967295, %s496_s15   ;;  %s350_s17 = sadd.s32 4294967294, %s496_s15   ;;  %s496_s15 = sphi %s527_s15, %s660_s15   ;;  %s492_s14 = sphi %s525_s14, %s659_s14   ;;  %s488_s13 = sphi %s523_s13, %s658_s13   ;;  %s484_s12 = sphi %s521_s12, %s657_s12  }
   0x4   : > { %s546_s18 = sadd.s32 1, %s496_s15   ;;  %s91_s19 = sadd.s32 1, %s492_s14 }
   0x5   : > { %s88_s20 = ssub.s32 %s496_s15, %s546_s18  ;;  %p101_p0 = scmp.ne.s32.totalorder %s492_s14, %s488_s13 }
   0x6   : > { %p89_p1 = scmp.eq.s32.totalorder %s88_s20, 0  ;;  %p102_p2 = scmp.eq.s32.totalorder %s542_s16, 1 }
   0x7   : > { %p107_p3 = scmp.ne.s32.totalorder %s488_s13, %s484_s12  ;;  %p108_p4 = scmp.eq.s32.totalorder %s350_s17, 1 }
   0x8   : > { %s557_s21 = scalar_select %p89_p1, %s492_s14, %s91_s19  }
   0x9   : > { %p559_p5 = por %p102_p2, %p101_p0  ;;  %p563_p6 = por %p108_p4, %p107_p3 }
   0xa   : > { %p353_p7 = scmp.ge.s32.totalorder %s496_s15, 1  ;;  %p141_p8 = scmp.lt.s32.totalorder %s496_s15, 3 }
   0xc   : > { %p142_p9 = pnand %p353_p7, %p141_p8 }
   0xd   : > { %s355_s28 = sshll.u32 (!%p142_p9), %s542_s16, 1  ;;  %s162_s27 = sand.u32 (!%p142_p9), 1, %s488_s13  }
   0xe   : > { %145 = sbr.rel (%p142_p9) target bundleno = 247 (0xf7), region = 32  ;;  %p166_p10 = scmp.lt.s32.totalorder (!%p142_p9), %s355_s28, 3 }
   0xf   : > { %s611_s10 = scalar_lea.sflag (!%p142_p9), [#allocation3], %s162_s27 }
  0x13   : > { %v181_v0 = vld [vmem:[%s652_s1 + $0x38] sm:$0xff]  ;;  %v180_v1 = vld [vmem:[%s652_s1 + $0x30] sm:$0xff]  ;;  %v179_v2 = vld [vmem:[%s652_s1 + $0x28] sm:$0xff]  ;;  %s662_s28 = smov (!%p166_p10, %s355_s28), 3  ;;  %vm189_vm0 = vcmask 523264   ;;  %vm271_vm1 = vcmask 261120  }
  0x14   : > { %376 = vmatprep.subr.mxu0 %v181_v0  ;;  %v178_v3 = vld [vmem:[%s652_s1 + $0x20] sm:$0xff]  ;;  %s356_s6 = sshll.u32 %s662_s28, 3  ;;  %v177_v4 = vld [vmem:[%s652_s1 + $0x18] sm:$0xff]  ;;  %v176_v6 = vld [vmem:[%s652_s1 + $0x10] sm:$0xff]  ;;  %s354_s28 = sshll.u32 %s162_s27, 4 }
  0x15   : > { %377 = vmatpush3.msra.mxu0 %v181_v0  ;;  %s169_s11 = scalar_lea.vmem %s651_s0, %s356_s6  ;;  %v175_v7 = vld [vmem:[%s652_s1 + $0x8] sm:$0xff]  ;;  %v174_v8 = vld [vmem:[%s652_s1] sm:$0xff]  ;;  %s164_s4 = scalar_lea.vmem [#allocation2], %s354_s28 }
  0x16   : > { %378 = vmatprep.subr.mxu0 %v180_v1  ;;  %v172_v5 = vld [vmem:[%s169_s11] sm:$0xff]  ;;  %v173_v9 = vld [vmem:[%s169_s11 + $0x8] sm:$0xff]  ;;  %s288_s5 = sshll.u32 %s164_s4, 4  ;;  %s365_s6 = sshll.u32 %s542_s16, 8  ;;  %s604_s5 = int_to_ptr.vmem [resolvable:$true] %s288_s5 }
  0x17   : > { %379 = vmatpush3.msra.mxu0 %v180_v1  ;;  %392 = vmatprep.mubr.msk.f32.mxu0 %vm189_vm0, %v172_v5  ;;  %v357_v10 = vld [vmem:[%s653_s2] ss:$0 sm:$0xff]  ;;  %s609_s9 = scalar_lea.hbm %s654_s3, %s365_s6  ;;  %s436_s16 = scalar_lea.vmem %s604_s5, 256 }
  0x18   : > { %380 = vmatprep.subr.mxu0 %v179_v2  ;;  %p437_p11 = scmp.ne.s32.totalorder %s604_s5, %s436_s16  ;;  %s498_s11 = smov [#allocation2]  }
  0x19   : > { %381 = vmatpush3.msra.mxu0 %v179_v2  ;;  %s440_s17 = sshll.u32 %s498_s11, 4  ;;  %s441_s17 = int_to_ptr.vmem [resolvable:$false] %s440_s17 }
  0x1a   : > { %382 = vmatprep.subr.mxu0 %v178_v3  ;;  %p438_p12 = pnand %p437_p11, %p559_p5  ;;  %s442_s19 = scalar_lea.vmem %s441_s17, 512 }
  0x1b   : > { %383 = vmatpush3.msra.mxu0 %v178_v3  ;;  %p443_p0 = scmp.lt.s32.totalorder %s604_s5, %s441_s17  ;;  %p444_p1 = scmp.lt.s32.totalorder %s442_s19, %s436_s16 }
  0x1c   : > { %384 = vmatprep.subr.mxu0 %v177_v4  ;;  %p439_p13 = pneg %p438_p12 }
  0x1d   : > { %385 = vmatpush3.msra.mxu0 %v177_v4  ;;  %p445_p2 = por %p444_p1, %p443_p0 }
  0x1e   : > { %386 = vmatprep.subr.mxu0 %v176_v6 }
  0x1f   : > { %387 = vmatpush3.msra.mxu0 %v176_v6  ;;  %p446_p3 = pnand %p445_p2, %p439_p13 }
  0x20   : > { %388 = vmatprep.subr.mxu0 %v175_v7 }
  0x21   : > { %389 = vmatpush3.msra.mxu0 %v175_v7 }
  0x22   : > { %390 = vmatprep.subr.mxu0 %v174_v8 }
  0x23   : > { %391 = vmatpush3.msra.mxu0 %v174_v8 }
  0x24   : > { %393 = vmatmul.mubr.msk.f32.vlgmr.msra.gmra.mxu0 %vm189_vm0, %v173_v9 }
  0xe4   : > { %v394_v11 = vpop.f32.mrf.mxu0 }
  0xe5   : > { %v268_v12 = vadd.f32 %v394_v11, %v357_v10 }
  0xe6   : > { %v262_v13 = vpop.f32.mrf.mxu0 }
  0xe7   : > { %273 = vst.msk [vmem:[%s164_s4 + $0x8] sm:$0xff] %vm271_vm1, %v268_v12  ;;  %v263_v14 = vadd.f32 %v357_v10, %v262_v13 }
  0xe9   : > { %272 = vst.msk [vmem:[%s164_s4] sm:$0xff] %vm271_vm1, %v263_v14 }
  0xea   : > { %449 = shalt.err (!%p446_p3)
}
  0xeb   : > { %s450_s20 = scalar_lea.hbm %s609_s9, 256  ;;  %s454_s26 = scalar_lea.hbm %s654_s3, 512 }
  0xec   : > { %p451_p4 = scmp.ne.s32.totalorder %s609_s9, %s450_s20  ;;  %p455_p9 = scmp.lt.s32.totalorder %s609_s9, %s654_s3 }
  0xed   : > { %p456_p10 = scmp.lt.s32.totalorder %s454_s26, %s450_s20 }
  0xee   : > { %p452_p7 = pnand %p451_p4, %p559_p5 }
  0xef   : > { %p457_p11 = por %p456_p10, %p455_p9 }
  0xf0   : > { %p453_p8 = pneg %p452_p7 }
  0xf2   : > { %p458_p12 = pnand %p457_p11, %p453_p8 }
  0xf4   : > { %461 = shalt.err (!%p458_p12)
}
  0xf5   : > { %s499_s29 = smov 128   ;;  %s500_s30 = smov 8  }
  0xf6   : > { %395 = dma.vmem_to_hbm [thread:$0]  (%p559_p5), %s604_s5, 256, %s609_s9, %s611_s10, %s499_s29, %s499_s29, %s500_s30  }
  0xf7 PF: > { %p401_p13 = scmp.ge.s32.totalorder %s496_s15, 2  ;;  %s303_s4 = sand.u32 1, %s484_s12  }
  0xf8   : > { %s304_s6 = scalar_lea.sflag [#allocation3], %s303_s4 }
  0xf9   : > { %p398_p0 = pnand %p401_p13, %p563_p6 }
  0xfb   : > { %p399_p1 = pneg %p398_p0 }
  0xfd   : > { %479 = dma.done.wait (%p399_p1), %s304_s6, 256  }
  0xfe   : > { %481 = vsyncadd (%p399_p1), %s304_s6, 4294967040  ;;  %p13_p2 = scmp.ge.s32.totalorder %s546_s18, 4   ;;  %s657_s12 = smov %s488_s13 }
  0xff   : > { %s658_s13 = smov %s492_s14  ;;  %s659_s14 = smov %s557_s21 }
 0x100   : > { %s660_s15 = smov %s546_s18  ;;  %15 = sbr.rel (!%p13_p2) target bundleno = 3 (0x3), region = 67 }
 0x105   :  { %309 = vsyncpa [#allocation3], 1 }
 0x106   :  { %311 = vsyncpa [#allocation3 + $0x1], 1 }

</bundles_post_ra>
